<compile_context>
chip_gen: v7x
topology: tpu7x:2x2x1
jax: 0.10.0
libtpu: 0.0.40
codegen_flags: <defaults>
</compile_context>

<pallas_src>
import jax
import jax.numpy as jnp
from jax.experimental import pallas as pl
from jax.experimental.pallas import tpu as pltpu


def _round_up(x, m):
    return ((x + m - 1) // m) * m


def _cdiv(a, b):
    return (a + b - 1) // b


def _vmem_budget_bytes():
    """Usable scoped-VMEM budget: ~75% of physical, never the full capacity."""
    phys = None
    try:
        info = pltpu.get_tpu_info()
        phys = getattr(info, "vmem_capacity_bytes", None)
    except Exception:
        phys = None
    if not phys:
        phys = 64 * 1024 * 1024           # conservative default (v7x per-TC VMEM)
    return (int(phys) * 3) // 4           # ~48 MiB on v7x, ~96 MiB on v5e/v6e


def _per_row_bytes(E, Dp, Cp, cd_bytes, out_bytes):
    # Per batch-row VMEM: double-buffered x/out tiles + f32 intermediate h
    # (+ its low-precision copy fed to the second matmul when compute != f32).
    per = 2 * E * cd_bytes + 2 * Cp * out_bytes + Dp * 4
    if cd_bytes != 4:
        per += Dp * cd_bytes
    return per


def _fixed_bytes(E, Dp, Cp, cd_bytes):
    # Single-buffered (pl.Buffered(1)) resident weights + f32 biases.
    return (E * Dp + Dp * Cp) * cd_bytes + (Dp + Cp) * 4


def _pick_tb(B, E, Dp, Cp, cd_bytes, out_bytes, budget):
    """Batch tile: as large as the VMEM budget allows (multiple of 8), chosen so
    the padded batch carries only a few padded rows and the number of grid
    steps is >= 2 and even (balanced across v7x's two TensorCores)."""
    if B <= 8:
        return B                                   # single full-batch block
    per_row = _per_row_bytes(E, Dp, Cp, cd_bytes, out_bytes)
    avail = max(budget - _fixed_bytes(E, Dp, Cp, cd_bytes), 8 * per_row)
    tb_cap = min(2048, avail // per_row)
    tb_cap = max(8, tb_cap - tb_cap % 8)
    n = max(_cdiv(B, tb_cap), 2 if B >= 16 else 1)  # >= 2 grid steps when possible
    if n > 1 and n % 2 == 1:
        n += 1                                      # even step count (megacore balance)
    return _round_up(_cdiv(B, n), 8)


def prepare_decoder_weights(params, *, eps=1e-5, compute_dtype=jnp.float32):
    """One-time weight preparation, hoisted out of the per-call path:
      * fold eval-mode BatchNorm1d into the second Linear (exact in f32),
      * transpose weights to (in, out) layout,
      * zero-pad hidden dim D and class dim C to multiples of 128 (exact),
      * cast matmul operands to compute_dtype (biases stay f32)."""
    w1, b1 = params["w1"], params["b1"]                      # (D, E), (D,)
    gamma, beta = params["bn_gamma"], params["bn_beta"]
    rmean, rvar = params["bn_running_mean"], params["bn_running_var"]
    w2, b2 = params["w2"], params["b2"]                      # (C, D), (C,)

    D, E = w1.shape
    C = w2.shape[0]
    Dp = _round_up(D, 128)
    Cp = _round_up(C, 128)

    scale = (gamma.astype(jnp.float32)
             * jax.lax.rsqrt(rvar.astype(jnp.float32) + eps))            # (D,)
    shift = beta.astype(jnp.float32) - rmean.astype(jnp.float32) * scale  # (D,)
    w2_t = w2.T.astype(jnp.float32)                                      # (D, C)
    w2_eff = w2_t * scale[:, None]                                       # (D, C)
    b2_eff = b2.astype(jnp.float32) + shift @ w2_t                       # (C,)

    w1_t = jnp.pad(w1.T.astype(jnp.float32), ((0, 0), (0, Dp - D)))      # (E, Dp)
    b1_p = jnp.pad(b1.astype(jnp.float32), (0, Dp - D)).reshape(1, Dp)
    w2_eff = jnp.pad(w2_eff, ((0, Dp - D), (0, Cp - C)))                 # (Dp, Cp)
    b2_eff = jnp.pad(b2_eff, (0, Cp - C)).reshape(1, Cp)

    return {
        "w1_t": w1_t.astype(compute_dtype),
        "b1": b1_p,
        "w2_eff": w2_eff.astype(compute_dtype),
        "b2_eff": b2_eff,
        "cls_num": C,
        "compute_dtype": jnp.dtype(compute_dtype),
    }


def decoder_kernel(x_ref, w1_ref, b1_ref, w2_ref, b2_ref, o_ref):
    # x: (TB, E)  w1: (E, Dp)  b1: (1, Dp)  w2: (Dp, Cp)  b2: (1, Cp)  o: (TB, Cp)
    h = jnp.dot(x_ref[...], w1_ref[...], preferred_element_type=jnp.float32)
    h = jnp.maximum(h + b1_ref[...], 0.0)          # bias + ReLU, f32, lane-dense
    # BatchNorm1d (eval) already folded into w2/b2; dropout is identity in eval.
    y = jnp.dot(h.astype(w2_ref.dtype), w2_ref[...],
                preferred_element_type=jnp.float32)
    o_ref[...] = (y + b2_ref[...]).astype(o_ref.dtype)


def classification_decoder(x, prepared, *, out_dtype=jnp.float32, tb=None):
    """x: (B, encoder_dim). `prepared` = prepare_decoder_weights(...).
    Returns logits (B, cls_num) in out_dtype."""
    B, E = x.shape
    w1_t, b1 = prepared["w1_t"], prepared["b1"]
    w2_eff, b2_eff = prepared["w2_eff"], prepared["b2_eff"]
    C = prepared["cls_num"]
    cd = prepared["compute_dtype"]
    Dp, Cp = w2_eff.shape
    cd_bytes = jnp.dtype(cd).itemsize
    out_bytes = jnp.dtype(out_dtype).itemsize

    budget = _vmem_budget_bytes()
    if tb is None:
        tb = _pick_tb(B, E, Dp, Cp, cd_bytes, out_bytes, budget)
    B_pad = _round_up(B, tb)

    x_p = x.astype(cd)
    if B_pad != B:
        x_p = jnp.pad(x_p, ((0, B_pad - B), (0, 0)))

    vmem_est = (_fixed_bytes(E, Dp, Cp, cd_bytes)
                + tb * _per_row_bytes(E, Dp, Cp, cd_bytes, out_bytes))
    # Always set the scoped limit explicitly (v5e default is only 16 MiB); never
    # grant more than ~75% of physical VMEM (keeps v7x's 64 MiB spill-free).
    vmem_limit = int(min(budget, max(vmem_est * 3 // 2, 32 * 1024 * 1024)))

    resident = pl.Buffered(1)   # constant-index operands: no second buffer

    out_padded = pl.pallas_call(
        decoder_kernel,
        out_shape=jax.ShapeDtypeStruct((B_pad, Cp), out_dtype),
        grid=(B_pad // tb,),
        in_specs=[
            pl.BlockSpec((tb, E), lambda i: (i, 0)),
            pl.BlockSpec((E, Dp), lambda i: (0, 0), pipeline_mode=resident),
            pl.BlockSpec((1, Dp), lambda i: (0, 0), pipeline_mode=resident),
            pl.BlockSpec((Dp, Cp), lambda i: (0, 0), pipeline_mode=resident),
            pl.BlockSpec((1, Cp), lambda i: (0, 0), pipeline_mode=resident),
        ],
        out_specs=pl.BlockSpec((tb, Cp), lambda i: (i, 0)),
        compiler_params=pltpu.CompilerParams(
            dimension_semantics=("parallel",),
            vmem_limit_bytes=vmem_limit),
        cost_estimate=pl.CostEstimate(
            flops=2 * B_pad * (E * Dp + Dp * Cp),
            transcendentals=0,
            bytes_accessed=(B_pad * E * cd_bytes
                            + (E * Dp + Dp * Cp) * cd_bytes
                            + (Dp + Cp) * 4
                            + B_pad * Cp * out_bytes)),
    )(x_p, w1_t, b1, w2_eff, b2_eff)

    return out_padded[:B, :C]


def reference(x, params, eps=1e-5, compute_dtype=jnp.float32):
    """Pure-JAX reference matching PyTorch eval semantics (same input-cast policy)."""
    cd = compute_dtype
    h = jnp.dot(x.astype(cd), params["w1"].T.astype(cd),
                preferred_element_type=jnp.float32) + params["b1"]
    h = jnp.maximum(h, 0.0)
    scale = params["bn_gamma"] * jax.lax.rsqrt(params["bn_running_var"] + eps)
    shift = params["bn_beta"] - params["bn_running_mean"] * scale
    h = h * scale + shift
    y = jnp.dot(h.astype(cd), params["w2"].T.astype(cd),
                preferred_element_type=jnp.float32) + params["b2"]
    return y


if __name__ == "__main__":
    encoder_dim, decoder_dim, cls_num = 32, 64, 10
    batch = 16

    key = jax.random.PRNGKey(0)
    kx, k1, k2, k3, k4, k5, k6 = jax.random.split(key, 7)

    x = jax.random.normal(kx, (batch, encoder_dim), dtype=jnp.float32)

    params = {
        # PyTorch nn.Linear layout: weight (out, in), bias (out,)
        "w1": jax.random.normal(k1, (decoder_dim, encoder_dim), jnp.float32) * 0.1,
        "b1": jax.random.normal(k2, (decoder_dim,), jnp.float32) * 0.1,
        # nn.BatchNorm1d(decoder_dim) eval-mode parameters / running stats
        "bn_gamma": 1.0 + 0.1 * jax.random.normal(k3, (decoder_dim,), jnp.float32),
        "bn_beta": 0.1 * jax.random.normal(k4, (decoder_dim,), jnp.float32),
        "bn_running_mean": jnp.zeros((decoder_dim,), jnp.float32),
        "bn_running_var": jnp.ones((decoder_dim,), jnp.float32),
        "w2": jax.random.normal(k5, (cls_num, decoder_dim), jnp.float32) * 0.1,
        "b2": jax.random.normal(k6, (cls_num,), jnp.float32) * 0.1,
    }

    # Weight preparation is done ONCE and reused across calls.
    prep_f32 = prepare_decoder_weights(params)
    prep_bf16 = prepare_decoder_weights(params, compute_dtype=jnp.bfloat16)

    # fp32 path (numerically matches the PyTorch eval forward).
    out_f32 = jax.block_until_ready(classification_decoder(x, prep_f32))
    ref_f32 = reference(x, params)
    assert out_f32.shape == (batch, cls_num)
    assert jnp.allclose(out_f32, ref_f32, atol=1e-5, rtol=1e-5), "fp32 mismatch vs reference"

    # bf16 compute / fp32 accumulate & output (v6e / v7x MXU-friendly).
    out_bf16 = jax.block_until_ready(classification_decoder(x, prep_bf16))
    ref_bf16 = reference(x, params, compute_dtype=jnp.bfloat16)
    assert out_bf16.shape == (batch, cls_num)
    assert jnp.allclose(out_bf16, ref_bf16, atol=3e-2, rtol=2e-2), "bf16 mismatch vs reference"

    # bf16 compute with bf16 output writeback (halves output HBM traffic).
    out_bf16_o = jax.block_until_ready(
        classification_decoder(x, prep_bf16, out_dtype=jnp.bfloat16))
    assert out_bf16_o.shape == (batch, cls_num)
    assert out_bf16_o.dtype == jnp.bfloat16
    assert jnp.allclose(out_bf16_o.astype(jnp.float32), ref_bf16,
                        atol=1e-1, rtol=5e-2), "bf16-out mismatch vs reference"

    print("KERNEL_OK")
</pallas_src>

<mosaic_0001>
module attributes {stable_mosaic.version = 11 : i64} {
  func.func @decoder_kernel(%arg0: i32, %arg1: memref<8x32xf32, #tpu.memory_space<vmem>>, %arg2: memref<32x128xf32, #tpu.memory_space<vmem>>, %arg3: memref<1x128xf32, #tpu.memory_space<vmem>>, %arg4: memref<128x128xf32, #tpu.memory_space<vmem>>, %arg5: memref<1x128xf32, #tpu.memory_space<vmem>>, %arg6: memref<8x128xf32, #tpu.memory_space<vmem>>) attributes {dimension_semantics = [#tpu.dimension_semantics<parallel>], iteration_bounds = array<i64: 2>, scalar_prefetch = 0 : i64, scratch_operands = 0 : i64, tpu.core_type = #tpu.core_type<tc>, window_params = [{transform_indices = @transform_0, window_bounds = array<i64: 8, 32>}, {pipeline_mode = #tpu.pipeline_mode<synchronous>, transform_indices = @transform_1, window_bounds = array<i64: 32, 128>}, {pipeline_mode = #tpu.pipeline_mode<synchronous>, transform_indices = @transform_2, window_bounds = array<i64: 1, 128>}, {pipeline_mode = #tpu.pipeline_mode<synchronous>, transform_indices = @transform_3, window_bounds = array<i64: 128, 128>}, {pipeline_mode = #tpu.pipeline_mode<synchronous>, transform_indices = @transform_4, window_bounds = array<i64: 1, 128>}, {transform_indices = @transform_5, window_bounds = array<i64: 8, 128>}]} {
    %c0 = arith.constant 0 : index
    %c0_0 = arith.constant 0 : index
    %0 = vector.load %arg1[%c0, %c0_0] : memref<8x32xf32, #tpu.memory_space<vmem>>, vector<8x32xf32>
    %c0_1 = arith.constant 0 : index
    %c0_2 = arith.constant 0 : index
    %1 = vector.load %arg2[%c0_1, %c0_2] : memref<32x128xf32, #tpu.memory_space<vmem>>, vector<32x128xf32>
    %cst = arith.constant dense<0.000000e+00> : vector<8x128xf32>
    %2 = tpu.matmul %0, %1, %cst {dimension_numbers = #tpu.dot_dimension_numbers<[1], [0], [0], [1], [0, 0, 1, 1], [], []>} : vector<8x32xf32>, vector<32x128xf32>, vector<8x128xf32> -> vector<8x128xf32>
    %c0_3 = arith.constant 0 : index
    %c0_4 = arith.constant 0 : index
    %3 = vector.load %arg3[%c0_3, %c0_4] : memref<1x128xf32, #tpu.memory_space<vmem>>, vector<1x128xf32>
    %4 = vector.broadcast %3 : vector<1x128xf32> to vector<8x128xf32>
    %5 = arith.addf %2, %4 : vector<8x128xf32>
    %cst_5 = arith.constant 0.000000e+00 : f32
    %6 = vector.broadcast %cst_5 : f32 to vector<8x128xf32>
    %7 = arith.maximumf %5, %6 : vector<8x128xf32>
    %c0_6 = arith.constant 0 : index
    %c0_7 = arith.constant 0 : index
    %8 = vector.load %arg4[%c0_6, %c0_7] : memref<128x128xf32, #tpu.memory_space<vmem>>, vector<128x128xf32>
    %cst_8 = arith.constant dense<0.000000e+00> : vector<8x128xf32>
    %9 = tpu.matmul %7, %8, %cst_8 {dimension_numbers = #tpu.dot_dimension_numbers<[1], [0], [0], [1], [0, 0, 1, 1], [], []>} : vector<8x128xf32>, vector<128x128xf32>, vector<8x128xf32> -> vector<8x128xf32>
    %c0_9 = arith.constant 0 : index
    %c0_10 = arith.constant 0 : index
    %10 = vector.load %arg5[%c0_9, %c0_10] : memref<1x128xf32, #tpu.memory_space<vmem>>, vector<1x128xf32>
    %11 = vector.broadcast %10 : vector<1x128xf32> to vector<8x128xf32>
    %12 = arith.addf %9, %11 : vector<8x128xf32>
    %c0_11 = arith.constant 0 : index
    %c0_12 = arith.constant 0 : index
    %13 = vector.load %arg6[%c0_11, %c0_12] : memref<8x128xf32, #tpu.memory_space<vmem>>, vector<8x128xf32>
    tpu.vector_store %arg6[%c0_11, %c0_12], %12 {strides = array<i32>} : memref<8x128xf32, #tpu.memory_space<vmem>>, vector<8x128xf32>,
    return
  }
  func.func @transform_0(%arg0: i32) -> (i32, i32) {
    %c0_i32 = arith.constant 0 : i32
    %c0_i32_0 = arith.constant 0 : i32
    return %arg0, %c0_i32 : i32, i32
  }
  func.func @transform_1(%arg0: i32) -> (i32, i32) {
    %c0_i32 = arith.constant 0 : i32
    %c0_i32_0 = arith.constant 0 : i32
    %c0_i32_1 = arith.constant 0 : i32
    return %c0_i32, %c0_i32_0 : i32, i32
  }
  func.func @transform_2(%arg0: i32) -> (i32, i32) {
    %c0_i32 = arith.constant 0 : i32
    %c0_i32_0 = arith.constant 0 : i32
    %c0_i32_1 = arith.constant 0 : i32
    return %c0_i32, %c0_i32_0 : i32, i32
  }
  func.func @transform_3(%arg0: i32) -> (i32, i32) {
    %c0_i32 = arith.constant 0 : i32
    %c0_i32_0 = arith.constant 0 : i32
    %c0_i32_1 = arith.constant 0 : i32
    return %c0_i32, %c0_i32_0 : i32, i32
  }
  func.func @transform_4(%arg0: i32) -> (i32, i32) {
    %c0_i32 = arith.constant 0 : i32
    %c0_i32_0 = arith.constant 0 : i32
    %c0_i32_1 = arith.constant 0 : i32
    return %c0_i32, %c0_i32_0 : i32, i32
  }
  func.func @transform_5(%arg0: i32) -> (i32, i32) {
    %c0_i32 = arith.constant 0 : i32
    %c0_i32_0 = arith.constant 0 : i32
    return %arg0, %c0_i32 : i32, i32
  }
}

</mosaic_0001>

<bundles_post_ra>
// kernel: tpu_custom_call.1
= control target key start
LH: loop header
LB: loop body
LE: loop exit
PB: predicated region body
PF: predicated region fallthrough
CT: control target
= control target key end

     0   :  { %10 = vsyncpa [#allocation3], 0  ;;  %s1181_s0 = inlined_call_operand.hbm [shape: f32[16,32], index: 0, kind: input, shape index: {}]   ;;  %s1182_s1 = inlined_call_operand.hbm [shape: f32[32,128], index: 1, kind: input, shape index: {}]   ;;  %s1183_s2 = inlined_call_operand.vmem [shape: f32[1,128], index: 2, kind: input, shape index: {}]   ;;  %s1184_s3 = inlined_call_operand.hbm [shape: f32[128,128], index: 3, kind: input, shape index: {}]   ;;  %s1185_s4 = inlined_call_operand.vmem [shape: f32[1,128], index: 4, kind: input, shape index: {}]   ;;  %s1186_s5 = inlined_call_operand.hbm [shape: f32[16,128], index: 5, kind: output, shape index: {}]  }
   0x1   :  { %12 = vsyncpa [#allocation3 + $0x1], 0 }
   0x2   :  { %13 = vsyncpa [#allocation6], 0 }
   0x3   :  { %14 = vsyncpa [#allocation4], 0 }
   0x4   :  { %16 = vsyncpa [#allocation4 + $0x1], 0  ;;  %s939_s18 = smov 0   ;;  %s941_s19 = smov 0  }
   0x5   :  { %s943_s20 = smov 0   ;;  %s945_s21 = smov 0  }
   0x6 LB: > { %s960_s22 = sadd.s32 4294967295, %s898_s21   ;;  %s553_s23 = sadd.s32 4294967294, %s898_s21   ;;  %s898_s21 = sphi %s945_s21, %s1206_s21   ;;  %s894_s20 = sphi %s943_s20, %s1205_s20   ;;  %s890_s19 = sphi %s941_s19, %s1204_s19   ;;  %s886_s18 = sphi %s939_s18, %s1203_s18  }
   0x7   : > { %p42_p0 = scmp.ne.s32.totalorder %s890_s19, %s886_s18  ;;  %p1187_p1 = scmp.eq.s32.totalorder %s960_s22, 0 }
   0x8   : > { %p156_p3 = scmp.eq.s32.totalorder %s553_s23, 1  ;;  %p554_p5 = scmp.ge.s32.totalorder %s898_s21, 1 }
   0x9   : > { %p969_p4 = por %p1187_p1, %p42_p0  ;;  %p163_p7 = scmp.lt.s32.totalorder %s898_s21, 3 }
   0xa   : > { %p974_p6 = por %p156_p3, %p42_p0  ;;  %s900_s27 = smov [#allocation5]  }
   0xb   : > { %s1190_s24 = scalar_select %p969_p4, 1, 0 }
   0xc   : > { %s1191_s25 = scalar_select %p974_p6, 1, 0 }
   0xd   : > { %p979_p8 = pnand %p554_p5, %p163_p7  ;;  %s175_s28 = sshll.u32 %s900_s27, 4  ;;  %s983_s28 = int_to_ptr.vmem [resolvable:$true] %s175_s28 }
   0xe   : > { %s901_s30 = smov [#allocation7]   ;;  %s742_s9 = scalar_lea.hbm %s1182_s1, 512 }
   0xf   : > { %p682_p9 = pneg %p979_p8  ;;  %s191_s6 = sshll.u32 %s901_s30, 4  ;;  %s994_s6 = int_to_ptr.vmem [resolvable:$true] %s191_s6 }
  0x10   : > { %p743_p12 = scmp.ne.s32.totalorder %s1182_s1, %s742_s9  ;;  %p749_p5 = scmp.lt.u32.totalorder %s742_s9, %s1182_s1 }
  0x11   : > { %p990_p11 = pnand %p682_p9, %p1187_p1 }
  0x13   : > { %p744_p13 = pneg %p990_p11 }
  0x15   : > { %p745_p0 = pnand %p744_p13, %p743_p12 }
  0x17   : > { %p746_p3 = pneg %p745_p0 }
  0x19   : > { %p751_p7 = pnand %p749_p5, %p746_p3 }
  0x1b   : > { %754 = shalt.err (!%p751_p7)
}
  0x1c   : > { %s755_s14 = scalar_lea.vmem %s983_s28, 512  ;;  %p763_p2 = scmp.lt.s32.totalorder %s983_s28, %s983_s28 }
  0x1d   : > { %p756_p9 = scmp.ne.s32.totalorder %s983_s28, %s755_s14  ;;  %p764_p12 = scmp.lt.s32.totalorder %s755_s14, %s755_s14 }
  0x1f   : > { %p758_p10 = pnand %p756_p9, %p744_p13  ;;  %p765_p0 = por %p764_p12, %p763_p2 }
  0x21   : > { %p759_p1 = pneg %p758_p10 }
  0x23   : > { %p766_p6 = pnand %p765_p0, %p759_p1 }
  0x25   : > { %769 = shalt.err (!%p766_p6)
}
  0x26   : > { %s902_s15 = smov 128   ;;  %s903_s16 = smov 8  }
  0x27   : > { %685 = dma.hbm_to_vmem [thread:$0]  (!%p990_p11), %s1182_s1, 512, %s983_s28, [#allocation6], %s902_s15, %s902_s15, %s903_s16  }
  0x28   : > { %s770_s7 = scalar_lea.hbm %s1184_s3, 2048 }
  0x29   : > { %p771_p2 = scmp.ne.s32.totalorder %s1184_s3, %s770_s7  ;;  %p777_p10 = scmp.lt.u32.totalorder %s770_s7, %s1184_s3 }
  0x2b   : > { %p773_p1 = pnand %p771_p2, %p744_p13 }
  0x2d   : > { %p774_p6 = pneg %p773_p1 }
  0x2f   : > { %p779_p3 = pnand %p777_p10, %p774_p6 }
  0x31   : > { %782 = shalt.err (!%p779_p3)
}
  0x32   : > { %s783_s28 = scalar_lea.vmem %s994_s6, 2048  ;;  %p791_p12 = scmp.lt.s32.totalorder %s994_s6, %s994_s6 }
  0x33   : > { %p784_p5 = scmp.ne.s32.totalorder %s994_s6, %s783_s28  ;;  %p792_p0 = scmp.lt.s32.totalorder %s783_s28, %s783_s28 }
  0x35   : > { %p786_p7 = pnand %p784_p5, %p744_p13  ;;  %p793_p2 = por %p792_p0, %p791_p12 }
  0x37   : > { %p787_p9 = pneg %p786_p7 }
  0x39   : > { %p794_p1 = pnand %p793_p2, %p787_p9 }
  0x3b   : > { %797 = shalt.err (!%p794_p1)
}
  0x3c   : > { %688 = dma.hbm_to_vmem [thread:$0]  (!%p990_p11), %s1184_s3, 2048, %s994_s6, [#allocation6], %s902_s15, %s902_s15, %s903_s16  }
  0x3d   : > { %s1049_s14 = sadd.s32 1, %s898_s21   ;;  %s29_s29 = sadd.s32 1, %s894_s20 }
  0x3e   : > { %s26_s17 = ssub.s32 %s898_s21, %s1049_s14  ;;  %p36_p13 = scmp.ne.s32.totalorder %s894_s20, %s890_s19 }
  0x3f   : > { %p27_p6 = scmp.eq.s32.totalorder %s26_s17, 0  ;;  %p37_p10 = scmp.eq.s32.totalorder %s898_s21, 0 }
  0x40   : > { %p1194_p3 = scmp.eq.s32.totalorder %s960_s22, 1  ;;  %p699_p7 = scmp.lt.s32.totalorder %s898_s21, 2 }
  0x41   : > { %s1065_s27 = scalar_select %p27_p6, %s894_s20, %s29_s29  }
  0x42   : > { %p1059_p5 = por %p1194_p3, %p36_p13  ;;  %p38_p9 = por %p37_p10, %p36_p13 }
  0x43   : > { %s208_s30 = sand.u32 1, %s894_s20   ;;  %s559_s6 = sshll.u32 %s898_s21, 7 }
  0x44   : > { %s1195_s23 = scalar_select %p1059_p5, 1, 0 }
  0x45   : > { %s558_s7 = sshll.u32 %s208_s30, 3  ;;  %s1072_s8 = scalar_lea.hbm %s1181_s0, %s559_s6 }
  0x46   : > { %s212_s9 = scalar_lea.vmem [#allocation2], %s558_s7  ;;  %p1076_p11 = pnand %p699_p7, %p38_p9 }
  0x47   : > { %s219_s10 = sshll.u32 %s212_s9, 4  ;;  %s209_s28 = scalar_lea.sflag [#allocation3], %s208_s30  ;;  %s1074_s10 = int_to_ptr.vmem [resolvable:$true] %s219_s10 }
  0x48   : > { %s798_s12 = scalar_lea.hbm %s1072_s8, 128  ;;  %p800_p0 = pneg %p1076_p11 }
  0x49   : > { %p799_p12 = scmp.ne.s32.totalorder %s1072_s8, %s798_s12  ;;  %s803_s17 = scalar_lea.hbm %s1181_s0, 256 }
  0x4a   : > { %p804_p13 = scmp.lt.u32.totalorder %s1072_s8, %s1181_s0  ;;  %p805_p6 = scmp.lt.u32.totalorder %s803_s17, %s798_s12 }
  0x4b   : > { %p801_p2 = pnand %p800_p0, %p799_p12  ;;  %p807_p3 = scmp.lt.u32.totalorder %s798_s12, %s1072_s8 }
  0x4c   : > { %p806_p10 = por %p805_p6, %p804_p13 }
  0x4d   : > { %p802_p1 = pneg %p801_p2 }
  0x4e   : > { %p808_p7 = por %p807_p3, %p806_p10 }
  0x50   : > { %p809_p9 = pnand %p808_p7, %p802_p1 }
  0x52   : > { %812 = shalt.err (!%p809_p9)
}
  0x53   : > { %s813_s30 = scalar_lea.vmem %s1074_s10, 128  ;;  %s904_s15 = smov [#allocation2]  }
  0x54   : > { %p814_p12 = scmp.ne.s32.totalorder %s1074_s10, %s813_s30  ;;  %s818_s16 = sshll.u32 %s904_s15, 4  ;;  %s819_s16 = int_to_ptr.vmem [resolvable:$false] %s818_s16 }
  0x55   : > { %s820_s9 = scalar_lea.vmem %s819_s16, 256  ;;  %p821_p4 = scmp.lt.s32.totalorder %s1074_s10, %s819_s16 }
  0x56   : > { %p816_p2 = pnand %p814_p12, %p800_p0  ;;  %p822_p13 = scmp.lt.s32.totalorder %s820_s9, %s813_s30 }
  0x58   : > { %p817_p5 = pneg %p816_p2  ;;  %p823_p6 = por %p822_p13, %p821_p4 }
  0x5a   : > { %p824_p10 = pnand %p823_p6, %p817_p5 }
  0x5c   : > { %827 = shalt.err (!%p824_p10)
}
  0x5d   : > { %692 = dma.hbm_to_vmem [thread:$0]  (!%p1076_p11), %s1072_s8, 128, %s1074_s10, %s209_s28  }
  0x5e   : > { %228 = sbr.rel (%p979_p8) target bundleno = 559 (0x22f), region = 40  ;;  %s1108_s12 = sand.u32 (!%p979_p8), 1, %s890_s19  }
  0x5f   : > { %s561_s13 = sshll.u32 (!%p979_p8), %s1108_s12, 3  ;;  %s231_s29 = scalar_lea.sflag (!%p979_p8), [#allocation3], %s1108_s12 }
  0x60   : > { %s1114_s17 = scalar_lea.vmem (!%p979_p8), [#allocation2], %s561_s13  ;;  %p1197_p4 = scmp.ne.s32.totalorder (!%p979_p8), %s1190_s24, 0 }
  0x65   : > { %873 = dma.done.wait (%p1197_p4), %s231_s29, 128  }
  0x66   : > { %875 = vsyncadd (%p1197_p4), %s231_s29, 4294967168  ;;  %p1198_p5 = scmp.eq.s32.totalorder %s960_s22, 0 }
  0x68   : > { %877 = dma.done.wait (%p1198_p5), [#allocation6], 2560   ;;  %p1199_p8 = pmov %p1198_p5 }
  0x69   : > { %v905_v0 = vmov 0.0|0.0   ;;  %vm906_vm0 = vmmov 0   ;;  %v907_v1 = vmov 0.0   ;;  %v270_v2 = vld [vmem:[#allocation5] sm:$0xff]  ;;  %v271_v3 = vld [vmem:[#allocation5 + $0x8] sm:$0xff]  ;;  %v272_v4 = vld [vmem:[#allocation5 + $0x10] sm:$0xff] }
  0x6a   : > { %879 = vsyncadd (%p1199_p8), [#allocation6], 4294964736  ;;  %640 = vmatprep.subr.bf16.mxu0 %v905_v0  ;;  %602 = vmatprep.mubr.msk.f32.mxu0 %vm906_vm0, %v907_v1  ;;  %v641_v5 = vpack.c.bf16 %v271_v3, %v270_v2  ;;  %v273_v6 = vld [vmem:[#allocation5 + $0x18] sm:$0xff]  ;;  %v356_v7 = vld [vmem:[#allocation7] sm:$0xff]  ;;  %vm281_vm1 = vcmask 261120   ;;  %s569_s11 = sshll.u32 %s960_s22, 7 }
  0x6b   : > { %646 = vmatprep.subr.bf16.mxu1 %v905_v0  ;;  %637 = vmatprep.mubr.msk.f32.mxu1 %vm906_vm0, %v907_v1  ;;  %v357_v8 = vld [vmem:[#allocation7 + $0x8] sm:$0xff]  ;;  %v358_v9 = vld [vmem:[#allocation7 + $0x10] sm:$0xff]  ;;  %v359_v10 = vld [vmem:[#allocation7 + $0x18] sm:$0xff]  ;;  %v644_v11 = vpack.c.bf16 %v273_v6, %v272_v4  ;;  %s268_s28 = scalar_lea.vmem [#allocation8], %s561_s13  ;;  %s1137_s15 = scalar_lea.hbm %s1186_s5, %s569_s11 }
  0x6c   : > { %642 = vmatpush3.bf16.msra.mxu0 %v641_v5  ;;  %v647_v12 = vpack.c.bf16 %v357_v8, %v356_v7  ;;  %v650_v13 = vpack.c.bf16 %v359_v10, %v358_v9  ;;  %v360_v14 = vld [vmem:[#allocation7 + $0x20] sm:$0xff]  ;;  %v361_v15 = vld [vmem:[#allocation7 + $0x28] sm:$0xff]  ;;  %v269_v16 = vld [vmem:[%s1114_s17] sm:$0xff]  ;;  %s464_s7 = sshll.u32 %s268_s28, 4  ;;  %s451_s16 = scalar_lea.sflag [#allocation4], %s1108_s12  ;;  %s1139_s7 = int_to_ptr.vmem [resolvable:$true] %s464_s7 }
  0x6d   : > { %643 = vmatprep.subr.bf16.mxu0 %v905_v0  ;;  %v653_v17 = vpack.c.bf16 %v361_v15, %v360_v14  ;;  %v362_v18 = vld [vmem:[#allocation7 + $0x30] sm:$0xff]  ;;  %v363_v19 = vld [vmem:[#allocation7 + $0x38] sm:$0xff]  ;;  %v364_v21 = vld [vmem:[#allocation7 + $0x40] sm:$0xff]  ;;  %s828_s9 = scalar_lea.vmem %s1139_s7, 128  ;;  %p1200_p0 = scmp.ne.s32.totalorder %s1195_s23, 0 }
  0x6e   : > { %648 = vmatpush3.bf16.msra.mxu1 %v647_v12  ;;  %v656_v20 = vpack.c.bf16 %v363_v19, %v362_v18  ;;  %v365_v22 = vld [vmem:[#allocation7 + $0x48] sm:$0xff]  ;;  %v366_v24 = vld [vmem:[#allocation7 + $0x50] sm:$0xff]  ;;  %v367_v25 = vld [vmem:[#allocation7 + $0x58] sm:$0xff]  ;;  %p829_p11 = scmp.ne.s32.totalorder %s1139_s7, %s828_s9  ;;  %s908_s22 = smov [#allocation8]  }
  0x6f   : > { %649 = vmatprep.subr.bf16.mxu1 %v905_v0  ;;  %v659_v23 = vpack.c.bf16 %v365_v22, %v364_v21  ;;  %v662_v26 = vpack.c.bf16 %v367_v25, %v366_v24  ;;  %v368_v27 = vld [vmem:[#allocation7 + $0x60] sm:$0xff]  ;;  %v369_v28 = vld [vmem:[#allocation7 + $0x68] sm:$0xff]  ;;  %v370_v30 = vld [vmem:[#allocation7 + $0x70] sm:$0xff]  ;;  %s832_s13 = sshll.u32 %s908_s22, 4  ;;  %s833_s13 = int_to_ptr.vmem [resolvable:$false] %s832_s13 }
  0x70   : > { %645 = vmatpush3.bf16.msra.mxu0 %v644_v11  ;;  %v665_v29 = vpack.c.bf16 %v369_v28, %v368_v27  ;;  %v371_v31 = vld [vmem:[#allocation7 + $0x78] sm:$0xff]  ;;  %v565_v33 = vld [vmem:[%s1183_s2] ss:$0 sm:$0xff]  ;;  %p830_p1 = pnand %p829_p11, %p1200_p0  ;;  %s834_s29 = scalar_lea.vmem %s833_s13, 256 }
  0x71   : > { %v668_v32 = vpack.c.bf16 %v371_v31, %v370_v30  ;;  %v567_v38 = vld [vmem:[%s1185_s4] ss:$0 sm:$0xff]  ;;  %p835_p7 = scmp.lt.s32.totalorder %s1139_s7, %s833_s13  ;;  %p836_p9 = scmp.lt.s32.totalorder %s834_s29, %s828_s9 }
  0x72   : > { %651 = vmatpush3.bf16.msra.mxu1 %v650_v13  ;;  %p831_p3 = pneg %p830_p1 }
  0x73   : > { %603 = vmatmul.mubr.msk.f32.vlgmr.msra.gmra.mrb[0].mxu0 %vm281_vm1, %v269_v16  ;;  %652 = vmatprep.subr.bf16.mxu1 %v905_v0  ;;  %p837_p12 = por %p836_p9, %p835_p7 }
  0x75   : > { %p838_p2 = pnand %p837_p12, %p831_p3 }
  0x76   : > { %654 = vmatpush3.bf16.msra.mxu1 %v653_v17 }
  0x77   : > { %655 = vmatprep.subr.bf16.mxu1 %v905_v0 }
  0x7a   : > { %657 = vmatpush3.bf16.msra.mxu1 %v656_v20 }
  0x7b   : > { %658 = vmatprep.subr.bf16.mxu1 %v905_v0 }
  0x7e   : > { %660 = vmatpush3.bf16.msra.mxu1 %v659_v23 }
  0x7f   : > { %661 = vmatprep.subr.bf16.mxu1 %v905_v0 }
  0x82   : > { %663 = vmatpush3.bf16.msra.mxu1 %v662_v26 }
  0x83   : > { %664 = vmatprep.subr.bf16.mxu1 %v905_v0 }
  0x86   : > { %666 = vmatpush3.bf16.msra.mxu1 %v665_v29 }
  0x87   : > { %667 = vmatprep.subr.bf16.mxu1 %v905_v0 }
  0x8a   : > { %669 = vmatpush3.bf16.msra.mxu1 %v668_v32 }
 0x146   : > { %v351_v34 = vpop.f32.mrb[0].mxu0 }
 0x147   : > { %v352_v35 = vadd.f32 %v565_v33, %v351_v34  ;;  %v604_v36 = vpop.f32.mrb[1].mxu0 }
 0x149   : > { %v355_v37 = vmax.f32 %v352_v35, 0.0 }
 0x14b   : > { %638 = vmatmul.mubr.f32.vlgmr.msra.gmra.mrb[0].mxu1 %v355_v37 }
 0x21e   : > { %v445_v39 = vpop.f32.mrb[0].mxu1 }
 0x21f   : > { %v446_v40 = vadd.f32 %v567_v38, %v445_v39  ;;  %v639_v41 = vpop.f32.mrb[1].mxu1 }
 0x221   : > { %449 = vst [vmem:[%s268_s28] sm:$0xff] %v446_v40 }
 0x222   : > { %841 = shalt.err (!%p838_p2)
}
 0x223   : > { %s842_s12 = scalar_lea.hbm %s1137_s15, 128  ;;  %s846_s26 = scalar_lea.hbm %s1186_s5, 256 }
 0x224   : > { %p843_p13 = scmp.ne.s32.totalorder %s1137_s15, %s842_s12  ;;  %p847_p4 = scmp.lt.u32.totalorder %s1137_s15, %s1186_s5 }
 0x225   : > { %p848_p5 = scmp.lt.u32.totalorder %s846_s26, %s842_s12  ;;  %p850_p11 = scmp.lt.u32.totalorder %s842_s12, %s1137_s15 }
 0x226   : > { %p844_p6 = pnand %p843_p13, %p1200_p0 }
 0x227   : > { %p849_p8 = por %p848_p5, %p847_p4 }
 0x228   : > { %p845_p10 = pneg %p844_p6 }
 0x229   : > { %p851_p1 = por %p850_p11, %p849_p8 }
 0x22b   : > { %p852_p3 = pnand %p851_p1, %p845_p10 }
 0x22d   : > { %855 = shalt.err (!%p852_p3)
}
 0x22e   : > { %680 = dma.vmem_to_hbm [thread:$0]  (%p1200_p0), %s1139_s7, 128, %s1137_s15, %s451_s16  }
 0x22f PF: > { %s476_s11 = sand.u32 1, %s886_s18   ;;  %p1201_p7 = scmp.ne.s32.totalorder %s1191_s25, 0 }
 0x230   : > { %p1202_p9 = scmp.ge.s32.totalorder %s898_s21, 2  ;;  %s477_s28 = scalar_lea.sflag [#allocation4], %s476_s11 }
 0x232   : > { %p694_p12 = pnand %p1202_p9, %p1201_p7 }
 0x234   : > { %881 = dma.done.wait (!%p694_p12), %s477_s28, 128  }
 0x235   : > { %883 = vsyncadd (!%p694_p12), %s477_s28, 4294967168  ;;  %p19_p2 = scmp.ge.s32.totalorder %s1049_s14, 4   ;;  %s1203_s18 = smov %s890_s19 }
 0x236   : > { %s1204_s19 = smov %s894_s20  ;;  %s1205_s20 = smov %s1065_s27 }
 0x237   : > { %s1206_s21 = smov %s1049_s14  ;;  %21 = sbr.rel (!%p19_p2) target bundleno = 6 (0x6), region = 93 }
 0x23e   :  { %482 = vsyncpa [#allocation3], 1 }
 0x23f   :  { %484 = vsyncpa [#allocation3 + $0x1], 1 }
 0x240   :  { %485 = vsyncpa [#allocation6], 1 }
 0x241   :  { %486 = vsyncpa [#allocation4], 1 }
 0x242   :  { %488 = vsyncpa [#allocation4 + $0x1], 1 }

</bundles_post_ra>
